<compile_context>
chip_gen: v7x
topology: tpu7x:2x2x1
jax: 0.10.0
libtpu: 0.0.40
codegen_flags: <defaults>
</compile_context>

<pallas_src>
import functools

import jax
import jax.numpy as jnp
from jax import lax
from jax.experimental import pallas as pl
from jax.experimental.pallas import tpu as pltpu

LANES = 128          # lane axis width (fast axis)
SUBLANES = 8         # sublane axis of one f32 vreg
MAX_BLOCK_ROWS = 512 # 512x128 f32 = 256 KiB per block (x2 buffers, x in+out ~ 1 MiB)
SUB_ROWS = 64        # inner chunk: 8 vregs per live array -> no register spills


def mlp_kernel(x_ref, p_ref, o_ref, *, hidden, sub_rows):
    # x_ref: (block_rows, 128) f32 VMEM  -- batch, lane-dense
    # p_ref: (3*hidden + 1,)    f32 SMEM -- packed [w1 | b1 | w2 | b2]
    # o_ref: (block_rows, 128) f32 VMEM
    block_rows = x_ref.shape[0]
    b2 = p_ref[3 * hidden]

    def compute(x):
        # Fold the output bias into the accumulator init (saves one slab add).
        acc = jnp.full_like(x, b2)
        for j in range(hidden):  # static -> fully unrolled chain of VPU FMAs
            h = jnp.maximum(x * p_ref[j] + p_ref[hidden + j], 0.0)  # relu(hidden)
            acc = acc + h * p_ref[2 * hidden + j]                   # predict accum
        return acc

    if block_rows <= sub_rows:
        # Small block: one shot over the whole (<=64-row) tile.
        o_ref[...] = compute(x_ref[...])
    else:
        # Large block: keep the unrolled 20-term accumulation innermost over
        # 64-row sub-chunks so x/acc/h never exceed the register file.
        num_chunks = block_rows // sub_rows

        def chunk(c, carry):
            r0 = pl.multiple_of(c * sub_rows, sub_rows)
            o_ref[pl.ds(r0, sub_rows), :] = compute(x_ref[pl.ds(r0, sub_rows), :])
            return carry

        lax.fori_loop(0, num_chunks, chunk, 0, unroll=True)


def _round_up(a, b):
    return ((a + b - 1) // b) * b


@jax.jit
def net_forward(x, hidden_w, hidden_b, predict_w, predict_b):
    """x: (N, 1) f32. Weights in PyTorch Linear layout:
       hidden_w (H, 1), hidden_b (H,), predict_w (1, H), predict_b (1,)."""
    N = x.shape[0]
    hidden = hidden_w.shape[0]

    # Row-block sizing: lane-dense, multiple of 8 sublanes, capped at 512 rows.
    rows_needed = -(-N // LANES)
    if rows_needed <= SUB_ROWS:
        block_rows = _round_up(max(rows_needed, 1), SUBLANES)
    else:
        block_rows = min(MAX_BLOCK_ROWS, _round_up(rows_needed, SUB_ROWS))
    R = _round_up(rows_needed, block_rows)          # no partial grid blocks
    padded = R * LANES
    grid_steps = R // block_rows

    # Lane-dense input slab (pad/ravel/reshape fuse under this jit).
    x2d = jnp.pad(jnp.ravel(x).astype(jnp.float32), (0, padded - N)).reshape(R, LANES)

    # Pack all weights/biases into a single SMEM array: [w1 | b1 | w2 | b2].
    params = jnp.concatenate([
        jnp.ravel(hidden_w), jnp.ravel(hidden_b),
        jnp.ravel(predict_w), jnp.ravel(predict_b),
    ]).astype(jnp.float32)  # (3H + 1,) = 61 scalars -> 256 B of SMEM

    kernel = functools.partial(mlp_kernel, hidden=hidden, sub_rows=SUB_ROWS)

    out2d = pl.pallas_call(
        kernel,
        out_shape=jax.ShapeDtypeStruct((R, LANES), jnp.float32),
        grid=(grid_steps,),
        in_specs=[
            pl.BlockSpec((block_rows, LANES), lambda i: (i, 0)),      # x tile
            pl.BlockSpec(memory_space=pltpu.MemorySpace.SMEM),        # packed params
        ],
        out_specs=pl.BlockSpec((block_rows, LANES), lambda i: (i, 0)),
        compiler_params=pltpu.CompilerParams(
            # Batch axis is fully independent: shard across both TCs on v7x.
            dimension_semantics=("parallel",),
        ),
    )(x2d, params)

    # Padded tail rows hold garbage (relu(b1)*w2 sums + b2); slice them off.
    return out2d.reshape(padded)[:N].reshape(N, 1)


def reference_forward(x, hidden_w, hidden_b, predict_w, predict_b):
    h = jnp.maximum(x @ hidden_w.T + hidden_b, 0.0)
    return h @ predict_w.T + predict_b


if __name__ == "__main__":
    key = jax.random.PRNGKey(0)
    k_w1, k_b1, k_w2, k_b2 = jax.random.split(key, 4)

    IN, HID, OUT = 1, 20, 1

    # PyTorch Linear-style uniform(-1/sqrt(fan_in), 1/sqrt(fan_in)) init.
    bound1 = 1.0 / (IN ** 0.5)
    hidden_w = jax.random.uniform(k_w1, (HID, IN), jnp.float32, -bound1, bound1)
    hidden_b = jax.random.uniform(k_b1, (HID,), jnp.float32, -bound1, bound1)
    bound2 = 1.0 / (HID ** 0.5)
    predict_w = jax.random.uniform(k_w2, (OUT, HID), jnp.float32, -bound2, bound2)
    predict_b = jax.random.uniform(k_b2, (OUT,), jnp.float32, -bound2, bound2)

    # Test 1: exactly the spec's input -- torch.linspace(-1, 1, 1000) unsqueezed.
    N1 = 1000
    x1 = jnp.linspace(-1.0, 1.0, N1, dtype=jnp.float32).reshape(N1, 1)
    out1 = jax.block_until_ready(net_forward(x1, hidden_w, hidden_b, predict_w, predict_b))
    ref1 = reference_forward(x1, hidden_w, hidden_b, predict_w, predict_b)
    assert out1.shape == (N1, OUT)
    assert jnp.allclose(out1, ref1, atol=1e-5, rtol=1e-5)

    # Test 2: larger batch to exercise the multi-step grid + chunked inner loop.
    N2 = 70000
    x2 = jnp.linspace(-2.0, 2.0, N2, dtype=jnp.float32).reshape(N2, 1)
    out2 = jax.block_until_ready(net_forward(x2, hidden_w, hidden_b, predict_w, predict_b))
    ref2 = reference_forward(x2, hidden_w, hidden_b, predict_w, predict_b)
    assert out2.shape == (N2, OUT)
    assert jnp.allclose(out2, ref2, atol=1e-5, rtol=1e-5)

    print("KERNEL_OK")
</pallas_src>

<mosaic_0001>
module attributes {stable_mosaic.version = 11 : i64} {
  func.func @mlp_kernel(%arg0: i32, %arg1: memref<8x128xf32, #tpu.memory_space<vmem>>, %arg2: memref<61xf32, #tpu.memory_space<smem>>, %arg3: memref<8x128xf32, #tpu.memory_space<vmem>>) attributes {dimension_semantics = [#tpu.dimension_semantics<parallel>], iteration_bounds = array<i64: 1>, scalar_prefetch = 0 : i64, scratch_operands = 0 : i64, tpu.core_type = #tpu.core_type<tc>, window_params = [{transform_indices = @transform_0, window_bounds = array<i64: 8, 128>}, {transform_indices = @transform_1, window_bounds = array<i64: 61>}, {transform_indices = @transform_2, window_bounds = array<i64: 8, 128>}]} {
    %c60 = arith.constant 60 : index
    %0 = memref.load %arg2[%c60] : memref<61xf32, #tpu.memory_space<smem>>
    %c0 = arith.constant 0 : index
    %c0_0 = arith.constant 0 : index
    %1 = vector.load %arg1[%c0, %c0_0] : memref<8x128xf32, #tpu.memory_space<vmem>>, vector<8x128xf32>
    %2 = vector.broadcast %0 : f32 to vector<8x128xf32>
    %c0_1 = arith.constant 0 : index
    %3 = memref.load %arg2[%c0_1] : memref<61xf32, #tpu.memory_space<smem>>
    %4 = vector.broadcast %3 : f32 to vector<8x128xf32>
    %5 = arith.mulf %1, %4 : vector<8x128xf32>
    %c20 = arith.constant 20 : index
    %6 = memref.load %arg2[%c20] : memref<61xf32, #tpu.memory_space<smem>>
    %7 = vector.broadcast %6 : f32 to vector<8x128xf32>
    %8 = arith.addf %5, %7 : vector<8x128xf32>
    %cst = arith.constant 0.000000e+00 : f32
    %9 = vector.broadcast %cst : f32 to vector<8x128xf32>
    %10 = arith.maximumf %8, %9 : vector<8x128xf32>
    %c40 = arith.constant 40 : index
    %11 = memref.load %arg2[%c40] : memref<61xf32, #tpu.memory_space<smem>>
    %12 = vector.broadcast %11 : f32 to vector<8x128xf32>
    %13 = arith.mulf %10, %12 : vector<8x128xf32>
    %14 = arith.addf %2, %13 : vector<8x128xf32>
    %c1 = arith.constant 1 : index
    %15 = memref.load %arg2[%c1] : memref<61xf32, #tpu.memory_space<smem>>
    %16 = vector.broadcast %15 : f32 to vector<8x128xf32>
    %17 = arith.mulf %1, %16 : vector<8x128xf32>
    %c21 = arith.constant 21 : index
    %18 = memref.load %arg2[%c21] : memref<61xf32, #tpu.memory_space<smem>>
    %19 = vector.broadcast %18 : f32 to vector<8x128xf32>
    %20 = arith.addf %17, %19 : vector<8x128xf32>
    %cst_2 = arith.constant 0.000000e+00 : f32
    %21 = vector.broadcast %cst_2 : f32 to vector<8x128xf32>
    %22 = arith.maximumf %20, %21 : vector<8x128xf32>
    %c41 = arith.constant 41 : index
    %23 = memref.load %arg2[%c41] : memref<61xf32, #tpu.memory_space<smem>>
    %24 = vector.broadcast %23 : f32 to vector<8x128xf32>
    %25 = arith.mulf %22, %24 : vector<8x128xf32>
    %26 = arith.addf %14, %25 : vector<8x128xf32>
    %c2 = arith.constant 2 : index
    %27 = memref.load %arg2[%c2] : memref<61xf32, #tpu.memory_space<smem>>
    %28 = vector.broadcast %27 : f32 to vector<8x128xf32>
    %29 = arith.mulf %1, %28 : vector<8x128xf32>
    %c22 = arith.constant 22 : index
    %30 = memref.load %arg2[%c22] : memref<61xf32, #tpu.memory_space<smem>>
    %31 = vector.broadcast %30 : f32 to vector<8x128xf32>
    %32 = arith.addf %29, %31 : vector<8x128xf32>
    %cst_3 = arith.constant 0.000000e+00 : f32
    %33 = vector.broadcast %cst_3 : f32 to vector<8x128xf32>
    %34 = arith.maximumf %32, %33 : vector<8x128xf32>
    %c42 = arith.constant 42 : index
    %35 = memref.load %arg2[%c42] : memref<61xf32, #tpu.memory_space<smem>>
    %36 = vector.broadcast %35 : f32 to vector<8x128xf32>
    %37 = arith.mulf %34, %36 : vector<8x128xf32>
    %38 = arith.addf %26, %37 : vector<8x128xf32>
    %c3 = arith.constant 3 : index
    %39 = memref.load %arg2[%c3] : memref<61xf32, #tpu.memory_space<smem>>
    %40 = vector.broadcast %39 : f32 to vector<8x128xf32>
    %41 = arith.mulf %1, %40 : vector<8x128xf32>
    %c23 = arith.constant 23 : index
    %42 = memref.load %arg2[%c23] : memref<61xf32, #tpu.memory_space<smem>>
    %43 = vector.broadcast %42 : f32 to vector<8x128xf32>
    %44 = arith.addf %41, %43 : vector<8x128xf32>
    %cst_4 = arith.constant 0.000000e+00 : f32
    %45 = vector.broadcast %cst_4 : f32 to vector<8x128xf32>
    %46 = arith.maximumf %44, %45 : vector<8x128xf32>
    %c43 = arith.constant 43 : index
    %47 = memref.load %arg2[%c43] : memref<61xf32, #tpu.memory_space<smem>>
    %48 = vector.broadcast %47 : f32 to vector<8x128xf32>
    %49 = arith.mulf %46, %48 : vector<8x128xf32>
    %50 = arith.addf %38, %49 : vector<8x128xf32>
    %c4 = arith.constant 4 : index
    %51 = memref.load %arg2[%c4] : memref<61xf32, #tpu.memory_space<smem>>
    %52 = vector.broadcast %51 : f32 to vector<8x128xf32>
    %53 = arith.mulf %1, %52 : vector<8x128xf32>
    %c24 = arith.constant 24 : index
    %54 = memref.load %arg2[%c24] : memref<61xf32, #tpu.memory_space<smem>>
    %55 = vector.broadcast %54 : f32 to vector<8x128xf32>
    %56 = arith.addf %53, %55 : vector<8x128xf32>
    %cst_5 = arith.constant 0.000000e+00 : f32
    %57 = vector.broadcast %cst_5 : f32 to vector<8x128xf32>
    %58 = arith.maximumf %56, %57 : vector<8x128xf32>
    %c44 = arith.constant 44 : index
    %59 = memref.load %arg2[%c44] : memref<61xf32, #tpu.memory_space<smem>>
    %60 = vector.broadcast %59 : f32 to vector<8x128xf32>
    %61 = arith.mulf %58, %60 : vector<8x128xf32>
    %62 = arith.addf %50, %61 : vector<8x128xf32>
    %c5 = arith.constant 5 : index
    %63 = memref.load %arg2[%c5] : memref<61xf32, #tpu.memory_space<smem>>
    %64 = vector.broadcast %63 : f32 to vector<8x128xf32>
    %65 = arith.mulf %1, %64 : vector<8x128xf32>
    %c25 = arith.constant 25 : index
    %66 = memref.load %arg2[%c25] : memref<61xf32, #tpu.memory_space<smem>>
    %67 = vector.broadcast %66 : f32 to vector<8x128xf32>
    %68 = arith.addf %65, %67 : vector<8x128xf32>
    %cst_6 = arith.constant 0.000000e+00 : f32
    %69 = vector.broadcast %cst_6 : f32 to vector<8x128xf32>
    %70 = arith.maximumf %68, %69 : vector<8x128xf32>
    %c45 = arith.constant 45 : index
    %71 = memref.load %arg2[%c45] : memref<61xf32, #tpu.memory_space<smem>>
    %72 = vector.broadcast %71 : f32 to vector<8x128xf32>
    %73 = arith.mulf %70, %72 : vector<8x128xf32>
    %74 = arith.addf %62, %73 : vector<8x128xf32>
    %c6 = arith.constant 6 : index
    %75 = memref.load %arg2[%c6] : memref<61xf32, #tpu.memory_space<smem>>
    %76 = vector.broadcast %75 : f32 to vector<8x128xf32>
    %77 = arith.mulf %1, %76 : vector<8x128xf32>
    %c26 = arith.constant 26 : index
    %78 = memref.load %arg2[%c26] : memref<61xf32, #tpu.memory_space<smem>>
    %79 = vector.broadcast %78 : f32 to vector<8x128xf32>
    %80 = arith.addf %77, %79 : vector<8x128xf32>
    %cst_7 = arith.constant 0.000000e+00 : f32
    %81 = vector.broadcast %cst_7 : f32 to vector<8x128xf32>
    %82 = arith.maximumf %80, %81 : vector<8x128xf32>
    %c46 = arith.constant 46 : index
    %83 = memref.load %arg2[%c46] : memref<61xf32, #tpu.memory_space<smem>>
    %84 = vector.broadcast %83 : f32 to vector<8x128xf32>
    %85 = arith.mulf %82, %84 : vector<8x128xf32>
    %86 = arith.addf %74, %85 : vector<8x128xf32>
    %c7 = arith.constant 7 : index
    %87 = memref.load %arg2[%c7] : memref<61xf32, #tpu.memory_space<smem>>
    %88 = vector.broadcast %87 : f32 to vector<8x128xf32>
    %89 = arith.mulf %1, %88 : vector<8x128xf32>
    %c27 = arith.constant 27 : index
    %90 = memref.load %arg2[%c27] : memref<61xf32, #tpu.memory_space<smem>>
    %91 = vector.broadcast %90 : f32 to vector<8x128xf32>
    %92 = arith.addf %89, %91 : vector<8x128xf32>
    %cst_8 = arith.constant 0.000000e+00 : f32
    %93 = vector.broadcast %cst_8 : f32 to vector<8x128xf32>
    %94 = arith.maximumf %92, %93 : vector<8x128xf32>
    %c47 = arith.constant 47 : index
    %95 = memref.load %arg2[%c47] : memref<61xf32, #tpu.memory_space<smem>>
    %96 = vector.broadcast %95 : f32 to vector<8x128xf32>
    %97 = arith.mulf %94, %96 : vector<8x128xf32>
    %98 = arith.addf %86, %97 : vector<8x128xf32>
    %c8 = arith.constant 8 : index
    %99 = memref.load %arg2[%c8] : memref<61xf32, #tpu.memory_space<smem>>
    %100 = vector.broadcast %99 : f32 to vector<8x128xf32>
    %101 = arith.mulf %1, %100 : vector<8x128xf32>
    %c28 = arith.constant 28 : index
    %102 = memref.load %arg2[%c28] : memref<61xf32, #tpu.memory_space<smem>>
    %103 = vector.broadcast %102 : f32 to vector<8x128xf32>
    %104 = arith.addf %101, %103 : vector<8x128xf32>
    %cst_9 = arith.constant 0.000000e+00 : f32
    %105 = vector.broadcast %cst_9 : f32 to vector<8x128xf32>
    %106 = arith.maximumf %104, %105 : vector<8x128xf32>
    %c48 = arith.constant 48 : index
    %107 = memref.load %arg2[%c48] : memref<61xf32, #tpu.memory_space<smem>>
    %108 = vector.broadcast %107 : f32 to vector<8x128xf32>
    %109 = arith.mulf %106, %108 : vector<8x128xf32>
    %110 = arith.addf %98, %109 : vector<8x128xf32>
    %c9 = arith.constant 9 : index
    %111 = memref.load %arg2[%c9] : memref<61xf32, #tpu.memory_space<smem>>
    %112 = vector.broadcast %111 : f32 to vector<8x128xf32>
    %113 = arith.mulf %1, %112 : vector<8x128xf32>
    %c29 = arith.constant 29 : index
    %114 = memref.load %arg2[%c29] : memref<61xf32, #tpu.memory_space<smem>>
    %115 = vector.broadcast %114 : f32 to vector<8x128xf32>
    %116 = arith.addf %113, %115 : vector<8x128xf32>
    %cst_10 = arith.constant 0.000000e+00 : f32
    %117 = vector.broadcast %cst_10 : f32 to vector<8x128xf32>
    %118 = arith.maximumf %116, %117 : vector<8x128xf32>
    %c49 = arith.constant 49 : index
    %119 = memref.load %arg2[%c49] : memref<61xf32, #tpu.memory_space<smem>>
    %120 = vector.broadcast %119 : f32 to vector<8x128xf32>
    %121 = arith.mulf %118, %120 : vector<8x128xf32>
    %122 = arith.addf %110, %121 : vector<8x128xf32>
    %c10 = arith.constant 10 : index
    %123 = memref.load %arg2[%c10] : memref<61xf32, #tpu.memory_space<smem>>
    %124 = vector.broadcast %123 : f32 to vector<8x128xf32>
    %125 = arith.mulf %1, %124 : vector<8x128xf32>
    %c30 = arith.constant 30 : index
    %126 = memref.load %arg2[%c30] : memref<61xf32, #tpu.memory_space<smem>>
    %127 = vector.broadcast %126 : f32 to vector<8x128xf32>
    %128 = arith.addf %125, %127 : vector<8x128xf32>
    %cst_11 = arith.constant 0.000000e+00 : f32
    %129 = vector.broadcast %cst_11 : f32 to vector<8x128xf32>
    %130 = arith.maximumf %128, %129 : vector<8x128xf32>
    %c50 = arith.constant 50 : index
    %131 = memref.load %arg2[%c50] : memref<61xf32, #tpu.memory_space<smem>>
    %132 = vector.broadcast %131 : f32 to vector<8x128xf32>
    %133 = arith.mulf %130, %132 : vector<8x128xf32>
    %134 = arith.addf %122, %133 : vector<8x128xf32>
    %c11 = arith.constant 11 : index
    %135 = memref.load %arg2[%c11] : memref<61xf32, #tpu.memory_space<smem>>
    %136 = vector.broadcast %135 : f32 to vector<8x128xf32>
    %137 = arith.mulf %1, %136 : vector<8x128xf32>
    %c31 = arith.constant 31 : index
    %138 = memref.load %arg2[%c31] : memref<61xf32, #tpu.memory_space<smem>>
    %139 = vector.broadcast %138 : f32 to vector<8x128xf32>
    %140 = arith.addf %137, %139 : vector<8x128xf32>
    %cst_12 = arith.constant 0.000000e+00 : f32
    %141 = vector.broadcast %cst_12 : f32 to vector<8x128xf32>
    %142 = arith.maximumf %140, %141 : vector<8x128xf32>
    %c51 = arith.constant 51 : index
    %143 = memref.load %arg2[%c51] : memref<61xf32, #tpu.memory_space<smem>>
    %144 = vector.broadcast %143 : f32 to vector<8x128xf32>
    %145 = arith.mulf %142, %144 : vector<8x128xf32>
    %146 = arith.addf %134, %145 : vector<8x128xf32>
    %c12 = arith.constant 12 : index
    %147 = memref.load %arg2[%c12] : memref<61xf32, #tpu.memory_space<smem>>
    %148 = vector.broadcast %147 : f32 to vector<8x128xf32>
    %149 = arith.mulf %1, %148 : vector<8x128xf32>
    %c32 = arith.constant 32 : index
    %150 = memref.load %arg2[%c32] : memref<61xf32, #tpu.memory_space<smem>>
    %151 = vector.broadcast %150 : f32 to vector<8x128xf32>
    %152 = arith.addf %149, %151 : vector<8x128xf32>
    %cst_13 = arith.constant 0.000000e+00 : f32
    %153 = vector.broadcast %cst_13 : f32 to vector<8x128xf32>
    %154 = arith.maximumf %152, %153 : vector<8x128xf32>
    %c52 = arith.constant 52 : index
    %155 = memref.load %arg2[%c52] : memref<61xf32, #tpu.memory_space<smem>>
    %156 = vector.broadcast %155 : f32 to vector<8x128xf32>
    %157 = arith.mulf %154, %156 : vector<8x128xf32>
    %158 = arith.addf %146, %157 : vector<8x128xf32>
    %c13 = arith.constant 13 : index
    %159 = memref.load %arg2[%c13] : memref<61xf32, #tpu.memory_space<smem>>
    %160 = vector.broadcast %159 : f32 to vector<8x128xf32>
    %161 = arith.mulf %1, %160 : vector<8x128xf32>
    %c33 = arith.constant 33 : index
    %162 = memref.load %arg2[%c33] : memref<61xf32, #tpu.memory_space<smem>>
    %163 = vector.broadcast %162 : f32 to vector<8x128xf32>
    %164 = arith.addf %161, %163 : vector<8x128xf32>
    %cst_14 = arith.constant 0.000000e+00 : f32
    %165 = vector.broadcast %cst_14 : f32 to vector<8x128xf32>
    %166 = arith.maximumf %164, %165 : vector<8x128xf32>
    %c53 = arith.constant 53 : index
    %167 = memref.load %arg2[%c53] : memref<61xf32, #tpu.memory_space<smem>>
    %168 = vector.broadcast %167 : f32 to vector<8x128xf32>
    %169 = arith.mulf %166, %168 : vector<8x128xf32>
    %170 = arith.addf %158, %169 : vector<8x128xf32>
    %c14 = arith.constant 14 : index
    %171 = memref.load %arg2[%c14] : memref<61xf32, #tpu.memory_space<smem>>
    %172 = vector.broadcast %171 : f32 to vector<8x128xf32>
    %173 = arith.mulf %1, %172 : vector<8x128xf32>
    %c34 = arith.constant 34 : index
    %174 = memref.load %arg2[%c34] : memref<61xf32, #tpu.memory_space<smem>>
    %175 = vector.broadcast %174 : f32 to vector<8x128xf32>
    %176 = arith.addf %173, %175 : vector<8x128xf32>
    %cst_15 = arith.constant 0.000000e+00 : f32
    %177 = vector.broadcast %cst_15 : f32 to vector<8x128xf32>
    %178 = arith.maximumf %176, %177 : vector<8x128xf32>
    %c54 = arith.constant 54 : index
    %179 = memref.load %arg2[%c54] : memref<61xf32, #tpu.memory_space<smem>>
    %180 = vector.broadcast %179 : f32 to vector<8x128xf32>
    %181 = arith.mulf %178, %180 : vector<8x128xf32>
    %182 = arith.addf %170, %181 : vector<8x128xf32>
    %c15 = arith.constant 15 : index
    %183 = memref.load %arg2[%c15] : memref<61xf32, #tpu.memory_space<smem>>
    %184 = vector.broadcast %183 : f32 to vector<8x128xf32>
    %185 = arith.mulf %1, %184 : vector<8x128xf32>
    %c35 = arith.constant 35 : index
    %186 = memref.load %arg2[%c35] : memref<61xf32, #tpu.memory_space<smem>>
    %187 = vector.broadcast %186 : f32 to vector<8x128xf32>
    %188 = arith.addf %185, %187 : vector<8x128xf32>
    %cst_16 = arith.constant 0.000000e+00 : f32
    %189 = vector.broadcast %cst_16 : f32 to vector<8x128xf32>
    %190 = arith.maximumf %188, %189 : vector<8x128xf32>
    %c55 = arith.constant 55 : index
    %191 = memref.load %arg2[%c55] : memref<61xf32, #tpu.memory_space<smem>>
    %192 = vector.broadcast %191 : f32 to vector<8x128xf32>
    %193 = arith.mulf %190, %192 : vector<8x128xf32>
    %194 = arith.addf %182, %193 : vector<8x128xf32>
    %c16 = arith.constant 16 : index
    %195 = memref.load %arg2[%c16] : memref<61xf32, #tpu.memory_space<smem>>
    %196 = vector.broadcast %195 : f32 to vector<8x128xf32>
    %197 = arith.mulf %1, %196 : vector<8x128xf32>
    %c36 = arith.constant 36 : index
    %198 = memref.load %arg2[%c36] : memref<61xf32, #tpu.memory_space<smem>>
    %199 = vector.broadcast %198 : f32 to vector<8x128xf32>
    %200 = arith.addf %197, %199 : vector<8x128xf32>
    %cst_17 = arith.constant 0.000000e+00 : f32
    %201 = vector.broadcast %cst_17 : f32 to vector<8x128xf32>
    %202 = arith.maximumf %200, %201 : vector<8x128xf32>
    %c56 = arith.constant 56 : index
    %203 = memref.load %arg2[%c56] : memref<61xf32, #tpu.memory_space<smem>>
    %204 = vector.broadcast %203 : f32 to vector<8x128xf32>
    %205 = arith.mulf %202, %204 : vector<8x128xf32>
    %206 = arith.addf %194, %205 : vector<8x128xf32>
    %c17 = arith.constant 17 : index
    %207 = memref.load %arg2[%c17] : memref<61xf32, #tpu.memory_space<smem>>
    %208 = vector.broadcast %207 : f32 to vector<8x128xf32>
    %209 = arith.mulf %1, %208 : vector<8x128xf32>
    %c37 = arith.constant 37 : index
    %210 = memref.load %arg2[%c37] : memref<61xf32, #tpu.memory_space<smem>>
    %211 = vector.broadcast %210 : f32 to vector<8x128xf32>
    %212 = arith.addf %209, %211 : vector<8x128xf32>
    %cst_18 = arith.constant 0.000000e+00 : f32
    %213 = vector.broadcast %cst_18 : f32 to vector<8x128xf32>
    %214 = arith.maximumf %212, %213 : vector<8x128xf32>
    %c57 = arith.constant 57 : index
    %215 = memref.load %arg2[%c57] : memref<61xf32, #tpu.memory_space<smem>>
    %216 = vector.broadcast %215 : f32 to vector<8x128xf32>
    %217 = arith.mulf %214, %216 : vector<8x128xf32>
    %218 = arith.addf %206, %217 : vector<8x128xf32>
    %c18 = arith.constant 18 : index
    %219 = memref.load %arg2[%c18] : memref<61xf32, #tpu.memory_space<smem>>
    %220 = vector.broadcast %219 : f32 to vector<8x128xf32>
    %221 = arith.mulf %1, %220 : vector<8x128xf32>
    %c38 = arith.constant 38 : index
    %222 = memref.load %arg2[%c38] : memref<61xf32, #tpu.memory_space<smem>>
    %223 = vector.broadcast %222 : f32 to vector<8x128xf32>
    %224 = arith.addf %221, %223 : vector<8x128xf32>
    %cst_19 = arith.constant 0.000000e+00 : f32
    %225 = vector.broadcast %cst_19 : f32 to vector<8x128xf32>
    %226 = arith.maximumf %224, %225 : vector<8x128xf32>
    %c58 = arith.constant 58 : index
    %227 = memref.load %arg2[%c58] : memref<61xf32, #tpu.memory_space<smem>>
    %228 = vector.broadcast %227 : f32 to vector<8x128xf32>
    %229 = arith.mulf %226, %228 : vector<8x128xf32>
    %230 = arith.addf %218, %229 : vector<8x128xf32>
    %c19 = arith.constant 19 : index
    %231 = memref.load %arg2[%c19] : memref<61xf32, #tpu.memory_space<smem>>
    %232 = vector.broadcast %231 : f32 to vector<8x128xf32>
    %233 = arith.mulf %1, %232 : vector<8x128xf32>
    %c39 = arith.constant 39 : index
    %234 = memref.load %arg2[%c39] : memref<61xf32, #tpu.memory_space<smem>>
    %235 = vector.broadcast %234 : f32 to vector<8x128xf32>
    %236 = arith.addf %233, %235 : vector<8x128xf32>
    %cst_20 = arith.constant 0.000000e+00 : f32
    %237 = vector.broadcast %cst_20 : f32 to vector<8x128xf32>
    %238 = arith.maximumf %236, %237 : vector<8x128xf32>
    %c59 = arith.constant 59 : index
    %239 = memref.load %arg2[%c59] : memref<61xf32, #tpu.memory_space<smem>>
    %240 = vector.broadcast %239 : f32 to vector<8x128xf32>
    %241 = arith.mulf %238, %240 : vector<8x128xf32>
    %242 = arith.addf %230, %241 : vector<8x128xf32>
    %c0_21 = arith.constant 0 : index
    %c0_22 = arith.constant 0 : index
    %243 = vector.load %arg3[%c0_21, %c0_22] : memref<8x128xf32, #tpu.memory_space<vmem>>, vector<8x128xf32>
    tpu.vector_store %arg3[%c0_21, %c0_22], %242 {strides = array<i32>} : memref<8x128xf32, #tpu.memory_space<vmem>>, vector<8x128xf32>,
    return
  }
  func.func @transform_0(%arg0: i32) -> (i32, i32) {
    %c0_i32 = arith.constant 0 : i32
    %c0_i32_0 = arith.constant 0 : i32
    return %arg0, %c0_i32 : i32, i32
  }
  func.func @transform_1(%arg0: i32) -> i32 {
    %c0_i32 = arith.constant 0 : i32
    %c0_i32_0 = arith.constant 0 : i32
    return %c0_i32 : i32
  }
  func.func @transform_2(%arg0: i32) -> (i32, i32) {
    %c0_i32 = arith.constant 0 : i32
    %c0_i32_0 = arith.constant 0 : i32
    return %arg0, %c0_i32 : i32, i32
  }
}

</mosaic_0001>

<bundles_post_ra>
// kernel: net_forward.1
= control target key start
LH: loop header
LB: loop body
LE: loop exit
PB: predicated region body
PF: predicated region fallthrough
CT: control target
= control target key end

     0   :  { %7 = vsyncpa [#allocation4], 0  ;;  %s592_s0 = inlined_call_operand.vmem [shape: f32[8,128], index: 0, kind: input, shape index: {}]   ;;  %s593_s1 = inlined_call_operand.vmem [shape: f32[61], index: 1, kind: input, shape index: {}]   ;;  %s594_s2 = inlined_call_operand.hbm [shape: f32[8,128], index: 2, kind: output, shape index: {}]  }
   0x1   :  { %8 = vsyncpa [#allocation3], 0  ;;  %s17_s11 = sshll.u32 %s593_s1, 4  ;;  %s18_s11 = int_to_ptr.vmem [resolvable:$true] %s17_s11 }
   0x2   :  { %s326_s12 = scalar_lea.vmem %s18_s11, 16  ;;  %p331_p1 = scmp.lt.s32.totalorder %s18_s11, %s18_s11 }
   0x3   :  { %p327_p0 = scmp.ne.s32.totalorder %s18_s11, %s326_s12  ;;  %p332_p2 = scmp.lt.s32.totalorder %s326_s12, %s326_s12 }
   0x5   :  { %p333_p3 = por %p332_p2, %p331_p1 }
   0x7   :  { %p334_p4 = pnand %p333_p3, %p327_p0 }
   0x9   :  { %337 = shalt.err (!%p334_p4)
}
   0xa   :  { %s364_s13 = smov [#allocation2]  }
   0xb   :  { %20 = dma.vmem_to_smem %s18_s11, 16, %s364_s13, [#allocation4]  }
   0xc   :  { %360 = dma.done.wait [#allocation4], 16  }
   0xd   :  { %361 = vsyncadd [#allocation4], 4294967280 }
   0xe   :  { %24 = sfence }
   0xf   :  { %s384_s14 = sld [smem:[#allocation2 + $0x3c]]  ;;  %s28_s15 = sld [smem:[#allocation2]]  ;;  %v395_v0 = vld [vmem:[%s592_s0] sm:$0xff] }
  0x10   :  { %s265_s16 = sld [smem:[#allocation2 + $0x14]]  ;;  %s386_s17 = sld [smem:[#allocation2 + $0x28]] }
  0x11   :  { %s267_s1 = sld [smem:[#allocation2 + $0x1]]  ;;  %s388_s18 = sld [smem:[#allocation2 + $0x15]] }
  0x12   :  { %s390_s19 = sld [smem:[#allocation2 + $0x29]]  ;;  %s270_s20 = sld [smem:[#allocation2 + $0x2]] }
  0x13   :  { %s397_s23 = sld [smem:[#allocation2 + $0x16]]  ;;  %s399_s24 = sld [smem:[#allocation2 + $0x2a]] }
  0x14   :  { %s401_s25 = sld [smem:[#allocation2 + $0x3]]  ;;  %s403_s26 = sld [smem:[#allocation2 + $0x17]] }
  0x15   :  { %v29_v1 = vstv %s28_s15  ;;  %s405_s27 = sld [smem:[#allocation2 + $0x2b]]  ;;  %s407_s28 = sld [smem:[#allocation2 + $0x4]]  ;;  %v27_v6 = vstv %s384_s14 }
  0x16   :  { %v30_v2 = vmul.f32 %v29_v1, %v395_v0  ;;  %v32_v3 = vstv %s265_s16  ;;  %s410_s0 = sld [smem:[#allocation2 + $0x18]]  ;;  %s412_s29 = sld [smem:[#allocation2 + $0x2c]]  ;;  %v36_v10 = vstv %s386_s17 }
  0x17   :  { %v40_v4 = vstv %s267_s1  ;;  %v43_v5 = vstv %s388_s18  ;;  %s415_s30 = sld [smem:[#allocation2 + $0x5]]  ;;  %s417_s3 = sld [smem:[#allocation2 + $0x19]] }
  0x18   :  { %v33_v7 = vadd.f32 %v32_v3, %v30_v2  ;;  %v41_v8 = vmul.f32 %v40_v4, %v395_v0  ;;  %v51_v9 = vstv %s270_s20  ;;  %s421_s4 = sld [smem:[#allocation2 + $0x6]]  ;;  %v47_v11 = vstv %s390_s19  ;;  %s427_s5 = sld [smem:[#allocation2 + $0x2d]] }
  0x19   :  { %v52_v12 = vmul.f32 %v51_v9, %v395_v0  ;;  %v54_v13 = vstv %s397_s23  ;;  %s429_s6 = sld [smem:[#allocation2 + $0x1a]]  ;;  %s433_s7 = sld [smem:[#allocation2 + $0x7]]  ;;  %v58_v19 = vstv %s399_s24 }
  0x1a   :  { %v34_v14 = vmax.f32 %v33_v7, 0.0  ;;  %v44_v15 = vadd.f32 %v43_v5, %v41_v8  ;;  %v62_v16 = vstv %s401_s25  ;;  %v65_v17 = vstv %s403_s26  ;;  %s438_s8 = sld [smem:[#allocation2 + $0x2e]]  ;;  %s440_s9 = sld [smem:[#allocation2 + $0x1b]] }
  0x1b   :  { %v55_v18 = vadd.f32 %v54_v13, %v52_v12  ;;  %v63_v20 = vmul.f32 %v62_v16, %v395_v0  ;;  %v73_v21 = vstv %s407_s28  ;;  %s444_s10 = sld [smem:[#allocation2 + $0x8]]  ;;  %s446_s11 = sld [smem:[#allocation2 + $0x1c]]  ;;  %v69_v28 = vstv %s405_s27 }
  0x1c   :  { %v37_v22 = vmul.f32 %v36_v10, %v34_v14  ;;  %v45_v23 = vmax.f32 %v44_v15, 0.0  ;;  %v74_v24 = vmul.f32 %v73_v21, %v395_v0  ;;  %v76_v25 = vstv %s410_s0  ;;  %s450_s12 = sld [smem:[#allocation2 + $0x2f]]  ;;  %s453_s13 = sld [smem:[#allocation2 + $0x9]] }
  0x1d   :  { %v56_v26 = vmax.f32 %v55_v18, 0.0  ;;  %v66_v27 = vadd.f32 %v65_v17, %v63_v20  ;;  %v84_v29 = vstv %s415_s30  ;;  %s455_s14 = sld [smem:[#allocation2 + $0x1d]]  ;;  %v80_v36 = vstv %s412_s29  ;;  %s459_s15 = sld [smem:[#allocation2 + $0x30]] }
  0x1e   :  { %v38_v30 = vadd.f32 %v37_v22, %v27_v6  ;;  %v48_v31 = vmul.f32 %v47_v11, %v45_v23  ;;  %v77_v32 = vadd.f32 %v76_v25, %v74_v24  ;;  %v85_v33 = vmul.f32 %v84_v29, %v395_v0  ;;  %s462_s16 = sld [smem:[#allocation2 + $0xa]]  ;;  %s464_s17 = sld [smem:[#allocation2 + $0x1e]] }
  0x1f   :  { %v59_v34 = vmul.f32 %v58_v19, %v56_v26  ;;  %v67_v35 = vmax.f32 %v66_v27, 0.0  ;;  %v87_v37 = vstv %s417_s3  ;;  %v95_v41 = vstv %s421_s4  ;;  %s469_s1 = sld [smem:[#allocation2 + $0x31]]  ;;  %s472_s18 = sld [smem:[#allocation2 + $0xb]] }
  0x20   :  { %v49_v38 = vadd.f32 %v48_v31, %v38_v30  ;;  %v78_v39 = vmax.f32 %v77_v32, 0.0  ;;  %v88_v40 = vadd.f32 %v87_v37, %v85_v33  ;;  %v91_v43 = vstv %s427_s5  ;;  %s474_s19 = sld [smem:[#allocation2 + $0x1f]]  ;;  %s479_s20 = sld [smem:[#allocation2 + $0x32]] }
  0x21   :  { %v70_v42 = vmul.f32 %v69_v28, %v67_v35  ;;  %v96_v44 = vmul.f32 %v95_v41, %v395_v0  ;;  %v98_v45 = vstv %s429_s6  ;;  %v106_v49 = vstv %s433_s7  ;;  %s483_s21 = sld [smem:[#allocation2 + $0xc]]  ;;  %s485_s22 = sld [smem:[#allocation2 + $0x20]] }
  0x22   :  { %v60_v46 = vadd.f32 %v59_v34, %v49_v38  ;;  %v81_v47 = vmul.f32 %v80_v36, %v78_v39  ;;  %v89_v48 = vmax.f32 %v88_v40, 0.0  ;;  %v102_v51 = vstv %s438_s8  ;;  %s488_s23 = sld [smem:[#allocation2 + $0x33]]  ;;  %s493_s24 = sld [smem:[#allocation2 + $0xd]] }
  0x23   :  { %v99_v50 = vadd.f32 %v98_v45, %v96_v44  ;;  %v107_v52 = vmul.f32 %v106_v49, %v395_v0  ;;  %v109_v53 = vstv %s440_s9  ;;  %v117_v56 = vstv %s444_s10  ;;  %s495_s25 = sld [smem:[#allocation2 + $0x21]]  ;;  %s498_s26 = sld [smem:[#allocation2 + $0x34]] }
  0x24   :  { %v71_v54 = vadd.f32 %v70_v42, %v60_v46  ;;  %v92_v55 = vmul.f32 %v91_v43, %v89_v48  ;;  %v120_v57 = vstv %s446_s11  ;;  %v118_v60 = vmul.f32 %v117_v56, %v395_v0  ;;  %s503_s27 = sld [smem:[#allocation2 + $0xe]]  ;;  %s505_s28 = sld [smem:[#allocation2 + $0x22]] }
  0x25   :  { %v100_v58 = vmax.f32 %v99_v50, 0.0  ;;  %v110_v59 = vadd.f32 %v109_v53, %v107_v52  ;;  %v113_v62 = vstv %s450_s12  ;;  %v128_v63 = vstv %s453_s13  ;;  %s508_s0 = sld [smem:[#allocation2 + $0x35]]  ;;  %s513_s29 = sld [smem:[#allocation2 + $0xf]] }
  0x26   :  { %v82_v61 = vadd.f32 %v81_v47, %v71_v54  ;;  %v131_v1 = vstv %s455_s14  ;;  %v121_v4 = vadd.f32 %v120_v57, %v118_v60  ;;  %v129_v5 = vmul.f32 %v128_v63, %v395_v0  ;;  %s515_s30 = sld [smem:[#allocation2 + $0x23]]  ;;  %s518_s3 = sld [smem:[#allocation2 + $0x36]] }
  0x27   :  { %v103_v2 = vmul.f32 %v102_v51, %v100_v58  ;;  %v111_v3 = vmax.f32 %v110_v59, 0.0  ;;  %v124_v7 = vstv %s459_s15  ;;  %v139_v8 = vstv %s462_s16  ;;  %s523_s4 = sld [smem:[#allocation2 + $0x10]]  ;;  %s525_s5 = sld [smem:[#allocation2 + $0x24]] }
  0x28   :  { %v93_v6 = vadd.f32 %v92_v55, %v82_v61  ;;  %v142_v9 = vstv %s464_s17  ;;  %v122_v11 = vmax.f32 %v121_v4, 0.0  ;;  %v132_v12 = vadd.f32 %v131_v1, %v129_v5  ;;  %s528_s6 = sld [smem:[#allocation2 + $0x37]]  ;;  %s533_s7 = sld [smem:[#allocation2 + $0x11]] }
  0x29   :  { %v114_v10 = vmul.f32 %v113_v62, %v111_v3  ;;  %v140_v13 = vmul.f32 %v139_v8, %v395_v0  ;;  %v135_v15 = vstv %s469_s1  ;;  %v150_v16 = vstv %s472_s18  ;;  %s535_s8 = sld [smem:[#allocation2 + $0x25]]  ;;  %s538_s9 = sld [smem:[#allocation2 + $0x38]] }
  0x2a   :  { %v104_v14 = vadd.f32 %v103_v2, %v93_v6  ;;  %v153_v17 = vstv %s474_s19  ;;  %v125_v18 = vmul.f32 %v124_v7, %v122_v11  ;;  %v133_v19 = vmax.f32 %v132_v12, 0.0  ;;  %s543_s10 = sld [smem:[#allocation2 + $0x12]]  ;;  %s545_s11 = sld [smem:[#allocation2 + $0x26]] }
  0x2b   :  { %v143_v20 = vadd.f32 %v142_v9, %v140_v13  ;;  %v151_v21 = vmul.f32 %v150_v16, %v395_v0  ;;  %v146_v23 = vstv %s479_s20  ;;  %v161_v24 = vstv %s483_s21  ;;  %s548_s12 = sld [smem:[#allocation2 + $0x39]]  ;;  %s553_s13 = sld [smem:[#allocation2 + $0x13]] }
  0x2c   :  { %v115_v22 = vadd.f32 %v114_v10, %v104_v14  ;;  %v164_v25 = vstv %s485_s22  ;;  %v136_v26 = vmul.f32 %v135_v15, %v133_v19  ;;  %v162_v29 = vmul.f32 %v161_v24, %v395_v0  ;;  %s555_s14 = sld [smem:[#allocation2 + $0x27]]  ;;  %s561_s15 = sld [smem:[#allocation2 + $0x3a]] }
  0x2d   :  { %v144_v27 = vmax.f32 %v143_v20, 0.0  ;;  %v154_v28 = vadd.f32 %v153_v17, %v151_v21  ;;  %v157_v31 = vstv %s488_s23  ;;  %v172_v32 = vstv %s493_s24  ;;  %s567_s16 = sld [smem:[#allocation2 + $0x3b]]  ;;  %s365_s17 = smov [#allocation5]  }
  0x2e   :  { %v126_v30 = vadd.f32 %v125_v18, %v115_v22  ;;  %v175_v33 = vstv %s495_s25  ;;  %v165_v36 = vadd.f32 %v164_v25, %v162_v29  ;;  %v173_v37 = vmul.f32 %v172_v32, %v395_v0  ;;  %s255_s1 = sshll.u32 %s365_s17, 4  ;;  %s256_s1 = int_to_ptr.vmem [resolvable:$true] %s255_s1 }
  0x2f   :  { %v147_v34 = vmul.f32 %v146_v23, %v144_v27  ;;  %v155_v35 = vmax.f32 %v154_v28, 0.0  ;;  %v168_v39 = vstv %s498_s26  ;;  %v183_v40 = vstv %s503_s27  ;;  %s338_s18 = scalar_lea.vmem %s256_s1, 128  ;;  %p343_p6 = scmp.lt.s32.totalorder %s256_s1, %s256_s1 }
  0x30   :  { %v137_v38 = vadd.f32 %v136_v26, %v126_v30  ;;  %v186_v41 = vstv %s505_s28  ;;  %v166_v43 = vmax.f32 %v165_v36, 0.0  ;;  %v176_v44 = vadd.f32 %v175_v33, %v173_v37  ;;  %p339_p5 = scmp.ne.s32.totalorder %s256_s1, %s338_s18  ;;  %p344_p7 = scmp.lt.s32.totalorder %s338_s18, %s338_s18 }
  0x31   :  { %v158_v42 = vmul.f32 %v157_v31, %v155_v35  ;;  %v184_v45 = vmul.f32 %v183_v40, %v395_v0  ;;  %v179_v47 = vstv %s508_s0  ;;  %v194_v48 = vstv %s513_s29 }
  0x32   :  { %v148_v46 = vadd.f32 %v147_v34, %v137_v38  ;;  %v197_v49 = vstv %s515_s30  ;;  %v169_v50 = vmul.f32 %v168_v39, %v166_v43  ;;  %v177_v51 = vmax.f32 %v176_v44, 0.0  ;;  %p345_p8 = por %p344_p7, %p343_p6 }
  0x33   :  { %v187_v52 = vadd.f32 %v186_v41, %v184_v45  ;;  %v195_v53 = vmul.f32 %v194_v48, %v395_v0  ;;  %v190_v55 = vstv %s518_s3  ;;  %v205_v56 = vstv %s523_s4 }
  0x34   :  { %v159_v54 = vadd.f32 %v158_v42, %v148_v46  ;;  %v208_v57 = vstv %s525_s5  ;;  %v180_v58 = vmul.f32 %v179_v47, %v177_v51  ;;  %v206_v61 = vmul.f32 %v205_v56, %v395_v0  ;;  %p346_p9 = pnand %p345_p8, %p339_p5 }
  0x35   :  { %v188_v59 = vmax.f32 %v187_v52, 0.0  ;;  %v198_v60 = vadd.f32 %v197_v49, %v195_v53  ;;  %v201_v63 = vstv %s528_s6  ;;  %v216_v1 = vstv %s533_s7 }
  0x36   :  { %v170_v62 = vadd.f32 %v169_v50, %v159_v54  ;;  %v219_v2 = vstv %s535_s8  ;;  %v209_v5 = vadd.f32 %v208_v57, %v206_v61  ;;  %v217_v6 = vmul.f32 %v216_v1, %v395_v0 }
  0x37   :  { %v191_v3 = vmul.f32 %v190_v55, %v188_v59  ;;  %v199_v4 = vmax.f32 %v198_v60, 0.0  ;;  %v212_v8 = vstv %s538_s9  ;;  %v227_v9 = vstv %s543_s10 }
  0x38   :  { %v181_v7 = vadd.f32 %v180_v58, %v170_v62  ;;  %v230_v10 = vstv %s545_s11  ;;  %v210_v12 = vmax.f32 %v209_v5, 0.0  ;;  %v220_v13 = vadd.f32 %v219_v2, %v217_v6 }
  0x39   :  { %v202_v11 = vmul.f32 %v201_v63, %v199_v4  ;;  %v228_v14 = vmul.f32 %v227_v9, %v395_v0  ;;  %v223_v16 = vstv %s548_s12  ;;  %v238_v17 = vstv %s553_s13 }
  0x3a   :  { %v192_v15 = vadd.f32 %v191_v3, %v181_v7  ;;  %v241_v18 = vstv %s555_s14  ;;  %v213_v19 = vmul.f32 %v212_v8, %v210_v12  ;;  %v221_v20 = vmax.f32 %v220_v13, 0.0 }
  0x3b   :  { %v231_v21 = vadd.f32 %v230_v10, %v228_v14  ;;  %v239_v22 = vmul.f32 %v238_v17, %v395_v0  ;;  %v234_v24 = vstv %s561_s15  ;;  %v245_v29 = vstv %s567_s16 }
  0x3c   :  { %v203_v23 = vadd.f32 %v202_v11, %v192_v15  ;;  %v224_v25 = vmul.f32 %v223_v16, %v221_v20 }
  0x3d   :  { %v232_v26 = vmax.f32 %v231_v21, 0.0  ;;  %v242_v27 = vadd.f32 %v241_v18, %v239_v22 }
  0x3e   :  { %v214_v28 = vadd.f32 %v213_v19, %v203_v23 }
  0x3f   :  { %v235_v30 = vmul.f32 %v234_v24, %v232_v26  ;;  %v243_v31 = vmax.f32 %v242_v27, 0.0 }
  0x40   :  { %v225_v32 = vadd.f32 %v224_v25, %v214_v28 }
  0x41   :  { %v246_v33 = vmul.f32 %v245_v29, %v243_v31 }
  0x42   :  { %v236_v34 = vadd.f32 %v235_v30, %v225_v32 }
  0x44   :  { %v247_v35 = vadd.f32 %v246_v33, %v236_v34 }
  0x46   :  { %248 = vst [vmem:[#allocation5] sm:$0xff] %v247_v35 }
  0x47   :  { %349 = shalt.err (!%p346_p9)
}
  0x48   :  { %s350_s21 = scalar_lea.hbm %s594_s2, 128 }
  0x49   :  { %p351_p10 = scmp.ne.s32.totalorder %s594_s2, %s350_s21  ;;  %p354_p11 = scmp.lt.u32.totalorder %s350_s21, %s594_s2 }
  0x4b   :  { %p356_p12 = pnand %p354_p11, %p351_p10 }
  0x4d   :  { %359 = shalt.err (!%p356_p12)
}
  0x4e   :  { %258 = dma.vmem_to_hbm [thread:$0]  %s256_s1, 128, %s594_s2, [#allocation3]  }
  0x4f   :  { %362 = dma.done.wait [#allocation3], 128  }
  0x50   :  { %363 = vsyncadd [#allocation3], 4294967168 }
  0x51   :  { %262 = vsyncpa [#allocation3], 1 }
  0x52   :  { %263 = vsyncpa [#allocation4], 1 }

</bundles_post_ra>
